<compile_context>
chip_gen: v6e
topology: v6e:2x2x1
jax: 0.10.0
libtpu: 0.0.40
codegen_flags: <defaults>
</compile_context>

<pallas_src>
import functools

import jax
import jax.numpy as jnp
import numpy as np
from jax.experimental import pallas as pl
from jax.experimental.pallas import tpu as pltpu

EPS = 1e-5
SLOPE = 0.2
LANE = 128
VMEM_LIMIT = 32 * 1024 * 1024   # safe headroom on v5e/v6e and v7x (64 MiB phys)


# ----------------------------- Pallas kernels ------------------------------ #

def conv_bn_stats_kernel(p_ref, w_ref, o_ref, sum_ref, sq_ref):
    """(TM, K)bf16 @ (K, Cp)bf16 -> (TM, Cp)f32 with fused BN statistics.

    sum/sq are resident (1, Cp) accumulators across the row-grid axis; that
    axis must therefore stay "arbitrary" so it is never sharded across cores.
    """
    @pl.when(pl.program_id(0) == 0)
    def _():
        sum_ref[...] = jnp.zeros_like(sum_ref)
        sq_ref[...] = jnp.zeros_like(sq_ref)

    y = jnp.dot(p_ref[...], w_ref[...], preferred_element_type=jnp.float32)
    o_ref[...] = y
    sum_ref[...] += jnp.sum(y, axis=0, keepdims=True)
    sq_ref[...] += jnp.sum(y * y, axis=0, keepdims=True)


def bn_act_kernel(x_ref, scale_ref, shift_ref, o_ref, *, slope, apply_act):
    y = x_ref[...] * scale_ref[...] + shift_ref[...]
    if apply_act:
        y = jnp.where(y > 0, y, slope * y)
    o_ref[...] = y


def bn2_shortcut_add_kernel(h2_ref, sc_ref, s2_ref, t2_ref, ss_ref, ts_ref,
                            o_ref, *, slope, apply_act):
    """Fused: bn2(+act) of conv2 output, bn(+act) of shortcut, residual add."""
    y2 = h2_ref[...] * s2_ref[...] + t2_ref[...]
    ys = sc_ref[...] * ss_ref[...] + ts_ref[...]
    if apply_act:
        y2 = jnp.where(y2 > 0, y2, slope * y2)
        ys = jnp.where(ys > 0, ys, slope * ys)
    o_ref[...] = y2 + ys


# ------------------------------ JAX glue ----------------------------------- #

def _round_up(n, m):
    return (n + m - 1) // m * m


def _row_tile(M, cap=512):
    """Largest row tile <= cap that evenly divides M (multiple of 8)."""
    if M <= cap:
        return M
    for t in range(cap - cap % 8, 7, -8):
        if M % t == 0:
            return t
    return M   # TODO(synk): masked-tail handling for ragged M


def im2col(x_nhwc, stride, pad):
    """3x3 patches -> (N*Ho*Wo, 9*C), feature order (ki, kj, c)."""
    N, H, W, C = x_nhwc.shape
    Ho = (H + 2 * pad - 3) // stride + 1
    Wo = (W + 2 * pad - 3) // stride + 1
    xp = jnp.pad(x_nhwc, ((0, 0), (pad, pad), (pad, pad), (0, 0)))
    cols = [xp[:, ki:ki + stride * Ho:stride, kj:kj + stride * Wo:stride, :]
            for ki in range(3) for kj in range(3)]
    patches = jnp.stack(cols, axis=3).reshape(N * Ho * Wo, 9 * C)
    return patches, Ho, Wo


def _w_to_mat(w_oihw):
    """(C_out, C_in, 3, 3) -> (9*C_in, C_out), matching im2col feature order."""
    return jnp.transpose(w_oihw, (2, 3, 1, 0)).reshape(-1, w_oihw.shape[0])


def conv_bn_stats_pallas(patches_bf16, wmat_bf16):
    """Conv-as-matmul with fused per-channel mean / biased variance."""
    M, K = patches_bf16.shape
    Cp = wmat_bf16.shape[1]
    TM = _row_tile(M)
    cost = pl.CostEstimate(
        flops=2 * M * K * Cp,
        transcendentals=0,
        bytes_accessed=M * K * 2 + K * Cp * 2 + M * Cp * 4 + 2 * Cp * 4)
    out, s, ss = pl.pallas_call(
        conv_bn_stats_kernel,
        out_shape=(jax.ShapeDtypeStruct((M, Cp), jnp.float32),
                   jax.ShapeDtypeStruct((1, Cp), jnp.float32),
                   jax.ShapeDtypeStruct((1, Cp), jnp.float32)),
        grid=(M // TM,),
        in_specs=[
            pl.BlockSpec((TM, K), lambda i: (i, 0)),
            pl.BlockSpec((K, Cp), lambda i: (0, 0)),
        ],
        out_specs=(
            pl.BlockSpec((TM, Cp), lambda i: (i, 0)),
            pl.BlockSpec((1, Cp), lambda i: (0, 0)),
            pl.BlockSpec((1, Cp), lambda i: (0, 0)),
        ),
        compiler_params=pltpu.CompilerParams(
            dimension_semantics=("arbitrary",),   # resident accumulators
            vmem_limit_bytes=VMEM_LIMIT),
        cost_estimate=cost,
    )(patches_bf16, wmat_bf16)
    mean = s[0] / M
    var = ss[0] / M - mean * mean    # biased variance (PyTorch BN training mode)
    return out, mean, var


def _bn_scale_shift(mean, var, gamma, beta, lane_lo, Cp):
    """Padded (1, Cp) scale/shift with gamma/beta placed at lanes [lane_lo, lane_lo+C)."""
    C = gamma.shape[0]
    g = jnp.zeros((Cp,), jnp.float32).at[lane_lo:lane_lo + C].set(gamma)
    b = jnp.zeros((Cp,), jnp.float32).at[lane_lo:lane_lo + C].set(beta)
    scale = g * jax.lax.rsqrt(var[:Cp] + EPS)
    shift = b - mean[:Cp] * scale
    return scale.reshape(1, Cp), shift.reshape(1, Cp)


def bn_act_pallas(x_rows, scale, shift, apply_act):
    M, Cp = x_rows.shape
    TM = _row_tile(M)
    row = pl.BlockSpec((TM, Cp), lambda i: (i, 0))
    vec = pl.BlockSpec((1, Cp), lambda i: (0, 0))
    return pl.pallas_call(
        functools.partial(bn_act_kernel, slope=SLOPE, apply_act=apply_act),
        out_shape=jax.ShapeDtypeStruct((M, Cp), jnp.float32),
        grid=(M // TM,),
        in_specs=[row, vec, vec],
        out_specs=row,
        compiler_params=pltpu.CompilerParams(
            dimension_semantics=("parallel",),
            vmem_limit_bytes=VMEM_LIMIT),
    )(x_rows, scale, shift)


def bn2_shortcut_add_pallas(h2_raw, sc_raw, s2, t2, ss, ts, apply_act):
    M, Cp = h2_raw.shape
    TM = _row_tile(M)
    row = pl.BlockSpec((TM, Cp), lambda i: (i, 0))
    vec = pl.BlockSpec((1, Cp), lambda i: (0, 0))
    # sc_raw may be wider (combined conv1+shortcut slab); shortcut channels sit
    # in its leading lanes, so read only its first Cp-lane block.
    sc_row = pl.BlockSpec((TM, Cp), lambda i: (i, 0))
    return pl.pallas_call(
        functools.partial(bn2_shortcut_add_kernel, slope=SLOPE,
                          apply_act=apply_act),
        out_shape=jax.ShapeDtypeStruct((M, Cp), jnp.float32),
        grid=(M // TM,),
        in_specs=[row, sc_row, vec, vec, vec, vec],
        out_specs=row,
        compiler_params=pltpu.CompilerParams(
            dimension_semantics=("parallel",),
            vmem_limit_bytes=VMEM_LIMIT),
    )(h2_raw, sc_raw, s2, t2, ss, ts)


def resblock_down_forward(x_nchw, params, act=True):
    """Matches ResBlock_Down.forward (k=3, pad=1; conv1 & shortcut stride=2,
    conv2 stride=1, as hardcoded in __init__); BN uses per-batch statistics."""
    x = jnp.transpose(x_nchw, (0, 2, 3, 1)).astype(jnp.bfloat16)   # NHWC, bf16
    N = x.shape[0]
    C_mid = params["w1"].shape[0]
    C_out = params["w2"].shape[0]

    # ---- stage 1: conv1 + shortcut conv share one im2col and one matmul ----
    patches1, Ho, Wo = im2col(x, stride=2, pad=1)           # (M1, 9*C_in) bf16
    w_cat = jnp.concatenate([_w_to_mat(params["ws"]),       # lanes [0, C_out)
                             _w_to_mat(params["w1"])],      # lanes [C_out, +C_mid)
                            axis=1)
    Cp1 = _round_up(C_out + C_mid, LANE)
    w_cat = jnp.pad(w_cat, ((0, 0), (0, Cp1 - w_cat.shape[1])))
    # NOTE: conv biases b1/b2/bs are dropped; training-mode BN cancels them.
    raw1, mean1, var1 = conv_bn_stats_pallas(patches1, w_cat.astype(jnp.bfloat16))

    # bn1 + LeakyReLU applied on the conv1 lanes of the combined slab
    s1, t1 = _bn_scale_shift(mean1, var1, params["g1"], params["be1"],
                             lane_lo=C_out, Cp=Cp1)
    h1_full = bn_act_pallas(raw1, s1, t1, apply_act=True)
    h1 = h1_full[:, C_out:C_out + C_mid].reshape(N, Ho, Wo, C_mid)

    # ---- stage 2: conv2 (stride 1) with fused BN stats ----
    patches2, _, _ = im2col(h1.astype(jnp.bfloat16), stride=1, pad=1)
    Cp2 = _round_up(C_out, LANE)
    w2 = jnp.pad(_w_to_mat(params["w2"]), ((0, 0), (0, Cp2 - C_out)))
    raw2, mean2, var2 = conv_bn_stats_pallas(patches2, w2.astype(jnp.bfloat16))

    # ---- stage 3: fused bn2(+act) + shortcut bn(+act) + residual add ----
    s2, t2 = _bn_scale_shift(mean2, var2, params["g2"], params["be2"],
                             lane_lo=0, Cp=Cp2)
    ssc, tsc = _bn_scale_shift(mean1, var1, params["gs"], params["bes"],
                               lane_lo=0, Cp=Cp2)
    out_rows = bn2_shortcut_add_pallas(raw2, raw1, s2, t2, ssc, tsc,
                                       apply_act=act)
    out = out_rows[:, :C_out].reshape(N, Ho, Wo, C_out)
    return jnp.transpose(out, (0, 3, 1, 2)).astype(jnp.float32)


# ------------------------------ reference ---------------------------------- #

def _conv_ref(x, w, b, stride, pad):
    y = jax.lax.conv_general_dilated(
        x, w, (stride, stride), ((pad, pad), (pad, pad)),
        dimension_numbers=("NCHW", "OIHW", "NCHW"))
    return y + b[None, :, None, None]


def _bn_ref(y, gamma, beta):
    mean = y.mean(axis=(0, 2, 3), keepdims=True)
    var = y.var(axis=(0, 2, 3), keepdims=True)   # biased
    yhat = (y - mean) / jnp.sqrt(var + EPS)
    return gamma[None, :, None, None] * yhat + beta[None, :, None, None]


def _lrelu(y):
    return jnp.where(y > 0, y, SLOPE * y)


def resblock_down_ref(x, p, act=True):
    h = _lrelu(_bn_ref(_conv_ref(x, p["w1"], p["b1"], 2, 1), p["g1"], p["be1"]))
    h = _bn_ref(_conv_ref(h, p["w2"], p["b2"], 1, 1), p["g2"], p["be2"])
    if act:
        h = _lrelu(h)
    s = _bn_ref(_conv_ref(x, p["ws"], p["bs"], 2, 1), p["gs"], p["bes"])
    if act:
        s = _lrelu(s)
    return h + s


# -------------------------------- main -------------------------------------- #

if __name__ == "__main__":
    N, C_in, H, W = 2, 4, 16, 16
    C_out = 8

    key = jax.random.PRNGKey(0)
    ks = jax.random.split(key, 12)
    params = {
        "w1": 0.2 * jax.random.normal(ks[0], (C_in, C_in, 3, 3), jnp.float32),
        "b1": 0.1 * jax.random.normal(ks[1], (C_in,), jnp.float32),
        "g1": 1.0 + 0.1 * jax.random.normal(ks[2], (C_in,), jnp.float32),
        "be1": 0.1 * jax.random.normal(ks[3], (C_in,), jnp.float32),
        "w2": 0.2 * jax.random.normal(ks[4], (C_out, C_in, 3, 3), jnp.float32),
        "b2": 0.1 * jax.random.normal(ks[5], (C_out,), jnp.float32),
        "g2": 1.0 + 0.1 * jax.random.normal(ks[6], (C_out,), jnp.float32),
        "be2": 0.1 * jax.random.normal(ks[7], (C_out,), jnp.float32),
        "ws": 0.2 * jax.random.normal(ks[8], (C_out, C_in, 3, 3), jnp.float32),
        "bs": 0.1 * jax.random.normal(ks[9], (C_out,), jnp.float32),
        "gs": 1.0 + 0.1 * jax.random.normal(ks[10], (C_out,), jnp.float32),
        "bes": 0.1 * jax.random.normal(ks[11], (C_out,), jnp.float32),
    }
    x = jax.random.normal(jax.random.PRNGKey(42), (N, C_in, H, W), jnp.float32)

    fwd = jax.jit(functools.partial(resblock_down_forward, act=True))
    out = jax.block_until_ready(fwd(x, params))

    ref = jax.block_until_ready(resblock_down_ref(x, params, act=True))
    assert out.shape == (N, C_out, H // 2, W // 2), out.shape
    # Tolerance accounts for bf16 MXU inputs (f32 accumulation / elementwise).
    np.testing.assert_allclose(np.asarray(out), np.asarray(ref),
                               rtol=4e-2, atol=4e-2)
    print("KERNEL_OK")
</pallas_src>

<mosaic_0001>
module attributes {stable_mosaic.version = 11 : i64} {
  func.func @bn_act_kernel(%arg0: i32, %arg1: memref<128x128xf32, #tpu.memory_space<vmem>>, %arg2: memref<1x128xf32, #tpu.memory_space<vmem>>, %arg3: memref<1x128xf32, #tpu.memory_space<vmem>>, %arg4: memref<128x128xf32, #tpu.memory_space<vmem>>) attributes {dimension_semantics = [#tpu.dimension_semantics<parallel>], iteration_bounds = array<i64: 1>, scalar_prefetch = 0 : i64, scratch_operands = 0 : i64, tpu.core_type = #tpu.core_type<tc>, window_params = [{transform_indices = @transform_0, window_bounds = array<i64: 128, 128>}, {pipeline_mode = #tpu.pipeline_mode<synchronous>, transform_indices = @transform_1, window_bounds = array<i64: 1, 128>}, {pipeline_mode = #tpu.pipeline_mode<synchronous>, transform_indices = @transform_2, window_bounds = array<i64: 1, 128>}, {transform_indices = @transform_3, window_bounds = array<i64: 128, 128>}]} {
    %c0 = arith.constant 0 : index
    %c0_0 = arith.constant 0 : index
    %0 = vector.load %arg1[%c0, %c0_0] : memref<128x128xf32, #tpu.memory_space<vmem>>, vector<128x128xf32>
    %c0_1 = arith.constant 0 : index
    %c0_2 = arith.constant 0 : index
    %1 = vector.load %arg2[%c0_1, %c0_2] : memref<1x128xf32, #tpu.memory_space<vmem>>, vector<1x128xf32>
    %2 = vector.broadcast %1 : vector<1x128xf32> to vector<128x128xf32>
    %3 = arith.mulf %0, %2 : vector<128x128xf32>
    %c0_3 = arith.constant 0 : index
    %c0_4 = arith.constant 0 : index
    %4 = vector.load %arg3[%c0_3, %c0_4] : memref<1x128xf32, #tpu.memory_space<vmem>>, vector<1x128xf32>
    %5 = vector.broadcast %4 : vector<1x128xf32> to vector<128x128xf32>
    %6 = arith.addf %3, %5 : vector<128x128xf32>
    %cst = arith.constant 0.000000e+00 : f32
    %7 = vector.broadcast %cst : f32 to vector<128x128xf32>
    %8 = arith.cmpf ogt, %6, %7 : vector<128x128xf32>
    %cst_5 = arith.constant 2.000000e-01 : f32
    %9 = vector.broadcast %cst_5 : f32 to vector<128x128xf32>
    %10 = arith.mulf %9, %6 : vector<128x128xf32>
    %11 = arith.select %8, %6, %10 : vector<128x128xi1>, vector<128x128xf32>
    %c0_6 = arith.constant 0 : index
    %c0_7 = arith.constant 0 : index
    %12 = vector.load %arg4[%c0_6, %c0_7] : memref<128x128xf32, #tpu.memory_space<vmem>>, vector<128x128xf32>
    tpu.vector_store %arg4[%c0_6, %c0_7], %11 {strides = array<i32>} : memref<128x128xf32, #tpu.memory_space<vmem>>, vector<128x128xf32>,
    return
  }
  func.func @transform_0(%arg0: i32) -> (i32, i32) {
    %c0_i32 = arith.constant 0 : i32
    %c0_i32_0 = arith.constant 0 : i32
    return %arg0, %c0_i32 : i32, i32
  }
  func.func @transform_1(%arg0: i32) -> (i32, i32) {
    %c0_i32 = arith.constant 0 : i32
    %c0_i32_0 = arith.constant 0 : i32
    %c0_i32_1 = arith.constant 0 : i32
    return %c0_i32, %c0_i32_0 : i32, i32
  }
  func.func @transform_2(%arg0: i32) -> (i32, i32) {
    %c0_i32 = arith.constant 0 : i32
    %c0_i32_0 = arith.constant 0 : i32
    %c0_i32_1 = arith.constant 0 : i32
    return %c0_i32, %c0_i32_0 : i32, i32
  }
  func.func @transform_3(%arg0: i32) -> (i32, i32) {
    %c0_i32 = arith.constant 0 : i32
    %c0_i32_0 = arith.constant 0 : i32
    return %arg0, %c0_i32 : i32, i32
  }
}

module attributes {stable_mosaic.version = 11 : i64} {
  func.func @conv_bn_stats_kernel(%arg0: i32, %arg1: memref<128x36xbf16, #tpu.memory_space<vmem>>, %arg2: memref<36x128xbf16, #tpu.memory_space<vmem>>, %arg3: memref<128x128xf32, #tpu.memory_space<vmem>>, %arg4: memref<1x128xf32, #tpu.memory_space<vmem>>, %arg5: memref<1x128xf32, #tpu.memory_space<vmem>>) attributes {dimension_semantics = [#tpu.dimension_semantics<arbitrary>], iteration_bounds = array<i64: 1>, scalar_prefetch = 0 : i64, scratch_operands = 0 : i64, tpu.core_type = #tpu.core_type<tc>, window_params = [{transform_indices = @transform_0, window_bounds = array<i64: 128, 36>}, {pipeline_mode = #tpu.pipeline_mode<synchronous>, transform_indices = @transform_1, window_bounds = array<i64: 36, 128>}, {transform_indices = @transform_2, window_bounds = array<i64: 128, 128>}, {pipeline_mode = #tpu.pipeline_mode<synchronous>, transform_indices = @transform_3, window_bounds = array<i64: 1, 128>}, {pipeline_mode = #tpu.pipeline_mode<synchronous>, transform_indices = @transform_4, window_bounds = array<i64: 1, 128>}]} {
    %c0_i32 = arith.constant 0 : i32
    %0 = arith.cmpi eq, %arg0, %c0_i32 : i32
    %1 = arith.extui %0 : i1 to i32
    %c0_i32_0 = arith.constant 0 : i32
    %2 = arith.cmpi ne, %1, %c0_i32_0 : i32
    scf.if %2 {
      %cst_16 = arith.constant 0.000000e+00 : f32
      %18 = vector.broadcast %cst_16 : f32 to vector<1x128xf32>
      %c0_17 = arith.constant 0 : index
      %c0_18 = arith.constant 0 : index
      %19 = vector.load %arg4[%c0_17, %c0_18] : memref<1x128xf32, #tpu.memory_space<vmem>>, vector<1x128xf32>
      tpu.vector_store %arg4[%c0_17, %c0_18], %18 {strides = array<i32>} : memref<1x128xf32, #tpu.memory_space<vmem>>, vector<1x128xf32>,
      %cst_19 = arith.constant 0.000000e+00 : f32
      %20 = vector.broadcast %cst_19 : f32 to vector<1x128xf32>
      %c0_20 = arith.constant 0 : index
      %c0_21 = arith.constant 0 : index
      %21 = vector.load %arg5[%c0_20, %c0_21] : memref<1x128xf32, #tpu.memory_space<vmem>>, vector<1x128xf32>
      tpu.vector_store %arg5[%c0_20, %c0_21], %20 {strides = array<i32>} : memref<1x128xf32, #tpu.memory_space<vmem>>, vector<1x128xf32>,
    } else {
    }
    %c0 = arith.constant 0 : index
    %c0_1 = arith.constant 0 : index
    %3 = vector.load %arg1[%c0, %c0_1] : memref<128x36xbf16, #tpu.memory_space<vmem>>, vector<128x36xbf16>
    %c0_2 = arith.constant 0 : index
    %c0_3 = arith.constant 0 : index
    %4 = vector.load %arg2[%c0_2, %c0_3] : memref<36x128xbf16, #tpu.memory_space<vmem>>, vector<36x128xbf16>
    %cst = arith.constant dense<0.000000e+00> : vector<128x128xf32>
    %5 = tpu.matmul %3, %4, %cst {dimension_numbers = #tpu.dot_dimension_numbers<[1], [0], [0], [1], [0, 0, 1, 1], [], []>} : vector<128x36xbf16>, vector<36x128xbf16>, vector<128x128xf32> -> vector<128x128xf32>
    %c0_4 = arith.constant 0 : index
    %c0_5 = arith.constant 0 : index
    %6 = vector.load %arg3[%c0_4, %c0_5] : memref<128x128xf32, #tpu.memory_space<vmem>>, vector<128x128xf32>
    tpu.vector_store %arg3[%c0_4, %c0_5], %5 {strides = array<i32>} : memref<128x128xf32, #tpu.memory_space<vmem>>, vector<128x128xf32>,
    %c0_6 = arith.constant 0 : index
    %c0_7 = arith.constant 0 : index
    %7 = vector.load %arg4[%c0_6, %c0_7] : memref<1x128xf32, #tpu.memory_space<vmem>>, vector<1x128xf32>
    %cst_8 = arith.constant dense<0.000000e+00> : vector<128xf32>
    %8 = vector.multi_reduction <add>, %5, %cst_8 [0] : vector<128x128xf32> to vector<128xf32>
    %9 = vector.shape_cast %8 : vector<128xf32> to vector<1x128xf32>
    %10 = arith.addf %7, %9 : vector<1x128xf32>
    %c0_9 = arith.constant 0 : index
    %c0_10 = arith.constant 0 : index
    %11 = vector.load %arg4[%c0_9, %c0_10] : memref<1x128xf32, #tpu.memory_space<vmem>>, vector<1x128xf32>
    tpu.vector_store %arg4[%c0_9, %c0_10], %10 {strides = array<i32>} : memref<1x128xf32, #tpu.memory_space<vmem>>, vector<1x128xf32>,
    %c0_11 = arith.constant 0 : index
    %c0_12 = arith.constant 0 : index
    %12 = vector.load %arg5[%c0_11, %c0_12] : memref<1x128xf32, #tpu.memory_space<vmem>>, vector<1x128xf32>
    %13 = arith.mulf %5, %5 : vector<128x128xf32>
    %cst_13 = arith.constant dense<0.000000e+00> : vector<128xf32>
    %14 = vector.multi_reduction <add>, %13, %cst_13 [0] : vector<128x128xf32> to vector<128xf32>
    %15 = vector.shape_cast %14 : vector<128xf32> to vector<1x128xf32>
    %16 = arith.addf %12, %15 : vector<1x128xf32>
    %c0_14 = arith.constant 0 : index
    %c0_15 = arith.constant 0 : index
    %17 = vector.load %arg5[%c0_14, %c0_15] : memref<1x128xf32, #tpu.memory_space<vmem>>, vector<1x128xf32>
    tpu.vector_store %arg5[%c0_14, %c0_15], %16 {strides = array<i32>} : memref<1x128xf32, #tpu.memory_space<vmem>>, vector<1x128xf32>,
    return
  }
  func.func @transform_0(%arg0: i32) -> (i32, i32) {
    %c0_i32 = arith.constant 0 : i32
    %c0_i32_0 = arith.constant 0 : i32
    return %arg0, %c0_i32 : i32, i32
  }
  func.func @transform_1(%arg0: i32) -> (i32, i32) {
    %c0_i32 = arith.constant 0 : i32
    %c0_i32_0 = arith.constant 0 : i32
    %c0_i32_1 = arith.constant 0 : i32
    return %c0_i32, %c0_i32_0 : i32, i32
  }
  func.func @transform_2(%arg0: i32) -> (i32, i32) {
    %c0_i32 = arith.constant 0 : i32
    %c0_i32_0 = arith.constant 0 : i32
    return %arg0, %c0_i32 : i32, i32
  }
  func.func @transform_3(%arg0: i32) -> (i32, i32) {
    %c0_i32 = arith.constant 0 : i32
    %c0_i32_0 = arith.constant 0 : i32
    %c0_i32_1 = arith.constant 0 : i32
    return %c0_i32, %c0_i32_0 : i32, i32
  }
  func.func @transform_4(%arg0: i32) -> (i32, i32) {
    %c0_i32 = arith.constant 0 : i32
    %c0_i32_0 = arith.constant 0 : i32
    %c0_i32_1 = arith.constant 0 : i32
    return %c0_i32, %c0_i32_0 : i32, i32
  }
}

module attributes {stable_mosaic.version = 11 : i64} {
  func.func @bn2_shortcut_add_kernel(%arg0: i32, %arg1: memref<128x128xf32, #tpu.memory_space<vmem>>, %arg2: memref<128x128xf32, #tpu.memory_space<vmem>>, %arg3: memref<1x128xf32, #tpu.memory_space<vmem>>, %arg4: memref<1x128xf32, #tpu.memory_space<vmem>>, %arg5: memref<1x128xf32, #tpu.memory_space<vmem>>, %arg6: memref<1x128xf32, #tpu.memory_space<vmem>>, %arg7: memref<128x128xf32, #tpu.memory_space<vmem>>) attributes {dimension_semantics = [#tpu.dimension_semantics<parallel>], iteration_bounds = array<i64: 1>, scalar_prefetch = 0 : i64, scratch_operands = 0 : i64, tpu.core_type = #tpu.core_type<tc>, window_params = [{transform_indices = @transform_0, window_bounds = array<i64: 128, 128>}, {transform_indices = @transform_1, window_bounds = array<i64: 128, 128>}, {pipeline_mode = #tpu.pipeline_mode<synchronous>, transform_indices = @transform_2, window_bounds = array<i64: 1, 128>}, {pipeline_mode = #tpu.pipeline_mode<synchronous>, transform_indices = @transform_3, window_bounds = array<i64: 1, 128>}, {pipeline_mode = #tpu.pipeline_mode<synchronous>, transform_indices = @transform_4, window_bounds = array<i64: 1, 128>}, {pipeline_mode = #tpu.pipeline_mode<synchronous>, transform_indices = @transform_5, window_bounds = array<i64: 1, 128>}, {transform_indices = @transform_6, window_bounds = array<i64: 128, 128>}]} {
    %c0 = arith.constant 0 : index
    %c0_0 = arith.constant 0 : index
    %0 = vector.load %arg1[%c0, %c0_0] : memref<128x128xf32, #tpu.memory_space<vmem>>, vector<128x128xf32>
    %c0_1 = arith.constant 0 : index
    %c0_2 = arith.constant 0 : index
    %1 = vector.load %arg3[%c0_1, %c0_2] : memref<1x128xf32, #tpu.memory_space<vmem>>, vector<1x128xf32>
    %2 = vector.broadcast %1 : vector<1x128xf32> to vector<128x128xf32>
    %3 = arith.mulf %0, %2 : vector<128x128xf32>
    %c0_3 = arith.constant 0 : index
    %c0_4 = arith.constant 0 : index
    %4 = vector.load %arg4[%c0_3, %c0_4] : memref<1x128xf32, #tpu.memory_space<vmem>>, vector<1x128xf32>
    %5 = vector.broadcast %4 : vector<1x128xf32> to vector<128x128xf32>
    %6 = arith.addf %3, %5 : vector<128x128xf32>
    %c0_5 = arith.constant 0 : index
    %c0_6 = arith.constant 0 : index
    %7 = vector.load %arg2[%c0_5, %c0_6] : memref<128x128xf32, #tpu.memory_space<vmem>>, vector<128x128xf32>
    %c0_7 = arith.constant 0 : index
    %c0_8 = arith.constant 0 : index
    %8 = vector.load %arg5[%c0_7, %c0_8] : memref<1x128xf32, #tpu.memory_space<vmem>>, vector<1x128xf32>
    %9 = vector.broadcast %8 : vector<1x128xf32> to vector<128x128xf32>
    %10 = arith.mulf %7, %9 : vector<128x128xf32>
    %c0_9 = arith.constant 0 : index
    %c0_10 = arith.constant 0 : index
    %11 = vector.load %arg6[%c0_9, %c0_10] : memref<1x128xf32, #tpu.memory_space<vmem>>, vector<1x128xf32>
    %12 = vector.broadcast %11 : vector<1x128xf32> to vector<128x128xf32>
    %13 = arith.addf %10, %12 : vector<128x128xf32>
    %cst = arith.constant 0.000000e+00 : f32
    %14 = vector.broadcast %cst : f32 to vector<128x128xf32>
    %15 = arith.cmpf ogt, %6, %14 : vector<128x128xf32>
    %cst_11 = arith.constant 2.000000e-01 : f32
    %16 = vector.broadcast %cst_11 : f32 to vector<128x128xf32>
    %17 = arith.mulf %16, %6 : vector<128x128xf32>
    %18 = arith.select %15, %6, %17 : vector<128x128xi1>, vector<128x128xf32>
    %cst_12 = arith.constant 0.000000e+00 : f32
    %19 = vector.broadcast %cst_12 : f32 to vector<128x128xf32>
    %20 = arith.cmpf ogt, %13, %19 : vector<128x128xf32>
    %cst_13 = arith.constant 2.000000e-01 : f32
    %21 = vector.broadcast %cst_13 : f32 to vector<128x128xf32>
    %22 = arith.mulf %21, %13 : vector<128x128xf32>
    %23 = arith.select %20, %13, %22 : vector<128x128xi1>, vector<128x128xf32>
    %24 = arith.addf %18, %23 : vector<128x128xf32>
    %c0_14 = arith.constant 0 : index
    %c0_15 = arith.constant 0 : index
    %25 = vector.load %arg7[%c0_14, %c0_15] : memref<128x128xf32, #tpu.memory_space<vmem>>, vector<128x128xf32>
    tpu.vector_store %arg7[%c0_14, %c0_15], %24 {strides = array<i32>} : memref<128x128xf32, #tpu.memory_space<vmem>>, vector<128x128xf32>,
    return
  }
  func.func @transform_0(%arg0: i32) -> (i32, i32) {
    %c0_i32 = arith.constant 0 : i32
    %c0_i32_0 = arith.constant 0 : i32
    return %arg0, %c0_i32 : i32, i32
  }
  func.func @transform_1(%arg0: i32) -> (i32, i32) {
    %c0_i32 = arith.constant 0 : i32
    %c0_i32_0 = arith.constant 0 : i32
    return %arg0, %c0_i32 : i32, i32
  }
  func.func @transform_2(%arg0: i32) -> (i32, i32) {
    %c0_i32 = arith.constant 0 : i32
    %c0_i32_0 = arith.constant 0 : i32
    %c0_i32_1 = arith.constant 0 : i32
    return %c0_i32, %c0_i32_0 : i32, i32
  }
  func.func @transform_3(%arg0: i32) -> (i32, i32) {
    %c0_i32 = arith.constant 0 : i32
    %c0_i32_0 = arith.constant 0 : i32
    %c0_i32_1 = arith.constant 0 : i32
    return %c0_i32, %c0_i32_0 : i32, i32
  }
  func.func @transform_4(%arg0: i32) -> (i32, i32) {
    %c0_i32 = arith.constant 0 : i32
    %c0_i32_0 = arith.constant 0 : i32
    %c0_i32_1 = arith.constant 0 : i32
    return %c0_i32, %c0_i32_0 : i32, i32
  }
  func.func @transform_5(%arg0: i32) -> (i32, i32) {
    %c0_i32 = arith.constant 0 : i32
    %c0_i32_0 = arith.constant 0 : i32
    %c0_i32_1 = arith.constant 0 : i32
    return %c0_i32, %c0_i32_0 : i32, i32
  }
  func.func @transform_6(%arg0: i32) -> (i32, i32) {
    %c0_i32 = arith.constant 0 : i32
    %c0_i32_0 = arith.constant 0 : i32
    return %arg0, %c0_i32 : i32, i32
  }
}

</mosaic_0001>

<bundles_post_ra>
// kernel: resblock_down_forward.5
= control target key start
LH: loop header
LB: loop body
LE: loop exit
PB: predicated region body
PF: predicated region fallthrough
CT: control target
= control target key end

     0   :  { %s305_s0 = inlined_call_operand.vmem [shape: f32[128,128], index: 0, kind: input, shape index: {}]   ;;  %s306_s1 = inlined_call_operand.vmem [shape: f32[1,128], index: 1, kind: input, shape index: {}]   ;;  %s307_s2 = inlined_call_operand.vmem [shape: f32[1,128], index: 2, kind: input, shape index: {}]   ;;  %s308_s3 = inlined_call_operand.vmem [shape: f32[128,128], index: 3, kind: output, shape index: {}]  }
   0x1   :  { %v14_v0 = vld [vmem:[%s305_s0] sm:$0xff]  ;;  %v15_v4 = vld [vmem:[%s305_s0 + $0x8] sm:$0xff]  ;;  %v16_v5 = vld [vmem:[%s305_s0 + $0x10] sm:$0xff] }
   0x2   :  { %v172_v1 = vld [vmem:[%s306_s1] ss:$0 sm:$0xff]  ;;  %v17_v6 = vld [vmem:[%s305_s0 + $0x18] sm:$0xff]  ;;  %v19_v11 = vld [vmem:[%s305_s0 + $0x28] sm:$0xff] }
   0x3   :  { %v177_v2 = vld [vmem:[%s307_s2] ss:$0 sm:$0xff]  ;;  %v37_v3 = vmul.f32 %v172_v1, %v14_v0  ;;  %v38_v7 = vmul.f32 %v172_v1, %v15_v4  ;;  %v39_v8 = vmul.f32 %v172_v1, %v16_v5  ;;  %v40_v9 = vmul.f32 %v172_v1, %v17_v6  ;;  %v20_v12 = vld [vmem:[%s305_s0 + $0x30] sm:$0xff]  ;;  %v21_v17 = vld [vmem:[%s305_s0 + $0x38] sm:$0xff] }
   0x4   :  { %v18_v10 = vld [vmem:[%s305_s0 + $0x20] sm:$0xff]  ;;  %v42_v15 = vmul.f32 %v172_v1, %v19_v11  ;;  %v43_v16 = vmul.f32 %v172_v1, %v20_v12  ;;  %v44_v21 = vmul.f32 %v172_v1, %v21_v17  ;;  %v23_v30 = vld [vmem:[%s305_s0 + $0x48] sm:$0xff]  ;;  %v24_v31 = vld [vmem:[%s305_s0 + $0x50] sm:$0xff] }
   0x5   :  { %v60_v13 = vadd.f32 %v177_v2, %v37_v3  ;;  %v41_v14 = vmul.f32 %v172_v1, %v18_v10  ;;  %v61_v18 = vadd.f32 %v177_v2, %v38_v7  ;;  %v62_v19 = vadd.f32 %v177_v2, %v39_v8  ;;  %v22_v25 = vld [vmem:[%s305_s0 + $0x40] sm:$0xff]  ;;  %v25_v43 = vld [vmem:[%s305_s0 + $0x58] sm:$0xff]  ;;  %v27_v45 = vld [vmem:[%s305_s0 + $0x68] sm:$0xff] }
   0x6   :  { %v63_v20 = vadd.f32 %v177_v2, %v40_v9  ;;  %v65_v24 = vadd.f32 %v177_v2, %v42_v15  ;;  %v66_v37 = vadd.f32 %v177_v2, %v43_v16  ;;  %v67_v38 = vadd.f32 %v177_v2, %v44_v21  ;;  %v26_v44 = vld [vmem:[%s305_s0 + $0x60] sm:$0xff]  ;;  %v28_v56 = vld [vmem:[%s305_s0 + $0x70] sm:$0xff]  ;;  %v29_v4 = vld [vmem:[%s305_s0 + $0x78] sm:$0xff] }
   0x7   :  { %vm76_vm0 = vcmp.gt.f32.partialorder %v60_v13, 0.0  ;;  %v92_v22 = vmul.f32 0.2, %v60_v13  ;;  %v64_v23 = vadd.f32 %v177_v2, %v41_v14  ;;  %vm77_vm1 = vcmp.gt.f32.partialorder %v61_v18, 0.0 }
   0x8   :  { %v93_v26 = vmul.f32 0.2, %v61_v18  ;;  %vm78_vm2 = vcmp.gt.f32.partialorder %v62_v19, 0.0  ;;  %v94_v27 = vmul.f32 0.2, %v62_v19  ;;  %vm79_vm3 = vcmp.gt.f32.partialorder %v63_v20, 0.0 }
   0x9   :  { %v108_v28 = vsel %vm76_vm0, %v60_v13, %v92_v22  ;;  %v95_v29 = vmul.f32 0.2, %v63_v20  ;;  %vm80_vm4 = vcmp.gt.f32.partialorder %v64_v23, 0.0  ;;  %v96_v34 = vmul.f32 0.2, %v64_v23 }
   0xa   :  { %124 = vst [vmem:[%s308_s3] sm:$0xff] %v108_v28  ;;  %v109_v32 = vsel %vm77_vm1, %v61_v18, %v93_v26  ;;  %v110_v33 = vsel %vm78_vm2, %v62_v19, %v94_v27  ;;  %vm81_vm5 = vcmp.gt.f32.partialorder %v65_v24, 0.0  ;;  %v97_v36 = vmul.f32 0.2, %v65_v24 }
   0xb   :  { %125 = vst [vmem:[%s308_s3 + $0x8] sm:$0xff] %v109_v32  ;;  %126 = vst [vmem:[%s308_s3 + $0x10] sm:$0xff] %v110_v33  ;;  %v111_v35 = vsel %vm79_vm3, %v63_v20, %v95_v29  ;;  %v112_v39 = vsel %vm80_vm4, %v64_v23, %v96_v34  ;;  %v45_v40 = vmul.f32 %v172_v1, %v22_v25  ;;  %vm82_vm6 = vcmp.gt.f32.partialorder %v66_v37, 0.0 }
   0xc   :  { %127 = vst [vmem:[%s308_s3 + $0x18] sm:$0xff] %v111_v35  ;;  %v46_v41 = vmul.f32 %v172_v1, %v23_v30  ;;  %v47_v42 = vmul.f32 %v172_v1, %v24_v31  ;;  %128 = vst [vmem:[%s308_s3 + $0x20] sm:$0xff] %v112_v39  ;;  %v113_v46 = vsel %vm81_vm5, %v65_v24, %v97_v36  ;;  %v98_v47 = vmul.f32 0.2, %v66_v37 }
   0xd   :  { %vm83_vm7 = vcmp.gt.f32.partialorder %v67_v38, 0.0  ;;  %129 = vst [vmem:[%s308_s3 + $0x28] sm:$0xff] %v113_v46  ;;  %v99_v48 = vmul.f32 0.2, %v67_v38  ;;  %v68_v49 = vadd.f32 %v177_v2, %v45_v40  ;;  %v48_v53 = vmul.f32 %v172_v1, %v25_v43 }
   0xe   :  { %v69_v50 = vadd.f32 %v177_v2, %v46_v41  ;;  %v70_v51 = vadd.f32 %v177_v2, %v47_v42  ;;  %v114_v52 = vsel %vm82_vm6, %v66_v37, %v98_v47  ;;  %v49_v54 = vmul.f32 %v172_v1, %v26_v44 }
   0xf   :  { %v50_v55 = vmul.f32 %v172_v1, %v27_v45  ;;  %130 = vst [vmem:[%s308_s3 + $0x30] sm:$0xff] %v114_v52  ;;  %v115_v57 = vsel %vm83_vm7, %v67_v38, %v99_v48  ;;  %vm84_vm8 = vcmp.gt.f32.partialorder %v68_v49, 0.0  ;;  %v100_v58 = vmul.f32 0.2, %v68_v49 }
  0x10   :  { %vm85_vm9 = vcmp.gt.f32.partialorder %v69_v50, 0.0  ;;  %131 = vst [vmem:[%s308_s3 + $0x38] sm:$0xff] %v115_v57  ;;  %v101_v59 = vmul.f32 0.2, %v69_v50  ;;  %vm86_vm10 = vcmp.gt.f32.partialorder %v70_v51, 0.0  ;;  %v71_v61 = vadd.f32 %v177_v2, %v48_v53 }
  0x11   :  { %v102_v60 = vmul.f32 0.2, %v70_v51  ;;  %v116_v62 = vsel %vm84_vm8, %v68_v49, %v100_v58  ;;  %v72_v63 = vadd.f32 %v177_v2, %v49_v54  ;;  %v73_v0 = vadd.f32 %v177_v2, %v50_v55 }
  0x12   :  { %v51_v3 = vmul.f32 %v172_v1, %v28_v56  ;;  %132 = vst [vmem:[%s308_s3 + $0x40] sm:$0xff] %v116_v62  ;;  %v117_v5 = vsel %vm85_vm9, %v69_v50, %v101_v59  ;;  %vm87_vm11 = vcmp.gt.f32.partialorder %v71_v61, 0.0  ;;  %v103_v7 = vmul.f32 0.2, %v71_v61 }
  0x13   :  { %v118_v6 = vsel %vm86_vm10, %v70_v51, %v102_v60  ;;  %133 = vst [vmem:[%s308_s3 + $0x48] sm:$0xff] %v117_v5  ;;  %vm88_vm12 = vcmp.gt.f32.partialorder %v72_v63, 0.0  ;;  %v104_v8 = vmul.f32 0.2, %v72_v63  ;;  %vm89_vm13 = vcmp.gt.f32.partialorder %v73_v0, 0.0 }
  0x14   :  { %134 = vst [vmem:[%s308_s3 + $0x50] sm:$0xff] %v118_v6  ;;  %v105_v9 = vmul.f32 0.2, %v73_v0  ;;  %v119_v10 = vsel %vm87_vm11, %v71_v61, %v103_v7  ;;  %v74_v11 = vadd.f32 %v177_v2, %v51_v3  ;;  %v52_v12 = vmul.f32 %v172_v1, %v29_v4 }
  0x15   :  { %135 = vst [vmem:[%s308_s3 + $0x58] sm:$0xff] %v119_v10  ;;  %v120_v13 = vsel %vm88_vm12, %v72_v63, %v104_v8 }
  0x16   :  { %v121_v14 = vsel %vm89_vm13, %v73_v0, %v105_v9  ;;  %136 = vst [vmem:[%s308_s3 + $0x60] sm:$0xff] %v120_v13  ;;  %vm90_vm14 = vcmp.gt.f32.partialorder %v74_v11, 0.0  ;;  %v106_v15 = vmul.f32 0.2, %v74_v11  ;;  %v75_v16 = vadd.f32 %v177_v2, %v52_v12 }
  0x17   :  { %137 = vst [vmem:[%s308_s3 + $0x68] sm:$0xff] %v121_v14 }
  0x18   :  { %v122_v17 = vsel %vm90_vm14, %v74_v11, %v106_v15  ;;  %vm91_vm15 = vcmp.gt.f32.partialorder %v75_v16, 0.0  ;;  %v107_v1 = vmul.f32 0.2, %v75_v16 }
  0x19   :  { %138 = vst [vmem:[%s308_s3 + $0x70] sm:$0xff] %v122_v17 }
  0x1a   :  { %v123_v18 = vsel %vm91_vm15, %v75_v16, %v107_v1 }
  0x1b   :  { %139 = vst [vmem:[%s308_s3 + $0x78] sm:$0xff] %v123_v18 }

// kernel: resblock_down_forward.4
= control target key start
LH: loop header
LB: loop body
LE: loop exit
PB: predicated region body
PF: predicated region fallthrough
CT: control target
= control target key end

     0   :  { %vm122_vm0 = vcmask 1041408   ;;  %vm97_vm1 = vcmask 293888   ;;  %v387_v12 = vmov 0.0   ;;  %s520_s1 = inlined_call_operand.vmem [shape: bf16[36,128], index: 1, kind: input, shape index: {}]   ;;  %s521_s0 = inlined_call_operand.vmem [shape: bf16[128,36], index: 0, kind: input, shape index: {}]   ;;  %s522_s3 = inlined_call_operand.vmem [shape: f32[1,128], index: 3, kind: output, shape index: {1}]   ;;  %s523_s4 = inlined_call_operand.vmem [shape: f32[1,128], index: 4, kind: output, shape index: {2}]   ;;  %s524_s2 = inlined_call_operand.vmem [shape: f32[128,128], index: 2, kind: output, shape index: {0}]  }
   0x1   :  { %v376_v0 = vld [vmem:[%s520_s1 + $0x10] ss:$0 sps:$4 sm:$0x33]   ;;  %v377_v1 = vld [vmem:[%s520_s1 + $0x8] sm:$0xff]   ;;  %v379_v3 = vld [vmem:[%s521_s0] sm:$0xff]   ;;  %19 = vst [vmem:[%s522_s3] sm:$0x1] %v387_v12 }
   0x2   :  { %373 = vmatprep.subr.msk.bf16.mxu0 %vm122_vm0, %v376_v0  ;;  %v124_v2 = vsel %vm122_vm0, %v376_v0, 0  ;;  %374 = vmatprep.subr.msk.bf16.mxu1 %vm122_vm0, %v376_v0  ;;  %v378_v4 = vld [vmem:[%s520_s1] sm:$0xff]   ;;  %v380_v6 = vld [vmem:[%s521_s0 + $0x8] sm:$0xff]   ;;  %v381_v8 = vld [vmem:[%s521_s0 + $0x10] sm:$0xff]   ;;  %20 = vst [vmem:[%s523_s4] sm:$0x1] %v387_v12 }
   0x3   :  { %346 = vmatpush3.bf16.msra.mxu0 %v124_v2  ;;  %370 = vmatpush3.bf16.msra.mxu1 %v124_v2  ;;  %v383_v5 = vld [vmem:[%s521_s0 + $0x20] sm:$0xff]   ;;  %v384_v7 = vld [vmem:[%s521_s0 + $0x28] sm:$0xff]   ;;  %v385_v9 = vld [vmem:[%s521_s0 + $0x30] sm:$0xff]  }
   0x4   :  { %347 = vmatprep.subr.bf16.mxu0 %v377_v1  ;;  %368 = vmatprep.subr.bf16.mxu1 %v377_v1  ;;  %v382_v10 = vld [vmem:[%s521_s0 + $0x18] sm:$0xff]  }
   0x5   :  { %351 = vmatprep.mubr.msk.bf16.mxu0 %vm97_vm1, %v379_v3  ;;  %359 = vmatprep.mubr.msk.bf16.mxu1 %vm97_vm1, %v383_v5  ;;  %v386_v11 = vld [vmem:[%s521_s0 + $0x38] sm:$0xff]  }
   0x7   :  { %348 = vmatpush3.bf16.msra.mxu0 %v377_v1  ;;  %371 = vmatpush3.bf16.msra.mxu1 %v377_v1 }
   0x8   :  { %349 = vmatprep.subr.bf16.mxu0 %v378_v4  ;;  %369 = vmatprep.subr.bf16.mxu1 %v378_v4 }
   0xb   :  { %350 = vmatpush3.bf16.msra.mxu0 %v378_v4  ;;  %372 = vmatpush3.bf16.msra.mxu1 %v378_v4 }
   0xe   :  { %352 = vmatmul.mubr.msk.bf16.vlgmr.msra.gmra.mxu0 %vm97_vm1, %v380_v6  ;;  %360 = vmatmul.mubr.msk.bf16.vlgmr.msra.gmra.mxu1 %vm97_vm1, %v384_v7 }
   0xf   :  { %355 = vmatprep.mubr.msk.bf16.mxu0 %vm97_vm1, %v381_v8  ;;  %363 = vmatprep.mubr.msk.bf16.mxu1 %vm97_vm1, %v385_v9 }
  0x16   :  { %356 = vmatmul.mubr.msk.bf16.gmra.mxu0 %vm97_vm1, %v382_v10  ;;  %364 = vmatmul.mubr.msk.bf16.gmra.mxu1 %vm97_vm1, %v386_v11 }
  0xce   :  { %v353_v13 = vpop.f32.mrf.mxu0  ;;  %v361_v14 = vpop.f32.mrf.mxu1 }
  0xcf   :  { %225 = vst [vmem:[%s524_s2 + $0x10] sm:$0xff] %v353_v13  ;;  %233 = vst [vmem:[%s524_s2 + $0x50] sm:$0xff] %v361_v14  ;;  %v266_v26 = vmul.f32 %v353_v13, %v353_v13  ;;  %v274_v56 = vmul.f32 %v361_v14, %v361_v14 }
  0xd0   :  { %v160_v15 = vpop.f32.mrf.mxu0  ;;  %v192_v16 = vpop.f32.mrf.mxu1 }
  0xd1   :  { %223 = vst [vmem:[%s524_s2] sm:$0xff] %v160_v15  ;;  %231 = vst [vmem:[%s524_s2 + $0x40] sm:$0xff] %v192_v16  ;;  %v264_v21 = vmul.f32 %v160_v15, %v160_v15  ;;  %v272_v50 = vmul.f32 %v192_v16, %v192_v16 }
  0xd2   :  { %v354_v17 = vpop.f32.mrf.mxu0  ;;  %v362_v18 = vpop.f32.mrf.mxu1 }
  0xd3   :  { %226 = vst [vmem:[%s524_s2 + $0x18] sm:$0xff] %v354_v17  ;;  %234 = vst [vmem:[%s524_s2 + $0x58] sm:$0xff] %v362_v18  ;;  %v267_v31 = vmul.f32 %v354_v17, %v354_v17  ;;  %v275_v59 = vmul.f32 %v362_v18, %v362_v18 }
  0xd4   :  { %v163_v19 = vpop.f32.mrf.mxu0  ;;  %v195_v20 = vpop.f32.mrf.mxu1 }
  0xd5   :  { %224 = vst [vmem:[%s524_s2 + $0x8] sm:$0xff] %v163_v19  ;;  %v240_v22 = vadd.f32 %v163_v19, %v160_v15  ;;  %v265_v23 = vmul.f32 %v163_v19, %v163_v19  ;;  %232 = vst [vmem:[%s524_s2 + $0x48] sm:$0xff] %v195_v20  ;;  %v273_v54 = vmul.f32 %v195_v20, %v195_v20 }
  0xd6   :  { %v357_v24 = vpop.f32.mrf.mxu0  ;;  %v365_v25 = vpop.f32.mrf.mxu1 }
  0xd7   :  { %v241_v27 = vadd.f32 %v353_v13, %v240_v22  ;;  %v280_v28 = vadd.f32 %v265_v23, %v264_v21  ;;  %229 = vst [vmem:[%s524_s2 + $0x30] sm:$0xff] %v357_v24  ;;  %237 = vst [vmem:[%s524_s2 + $0x70] sm:$0xff] %v365_v25  ;;  %v270_v44 = vmul.f32 %v357_v24, %v357_v24  ;;  %v263_v23 = vld [vmem:[%s523_s4] sm:$0x1] }
  0xd8   :  { %v176_v29 = vpop.f32.mrf.mxu0  ;;  %v208_v30 = vpop.f32.mrf.mxu1  ;;  %v278_v4 = vmul.f32 %v365_v25, %v365_v25 }
  0xd9   :  { %v281_v32 = vadd.f32 %v280_v28, %v266_v26  ;;  %227 = vst [vmem:[%s524_s2 + $0x20] sm:$0xff] %v176_v29  ;;  %v242_v33 = vadd.f32 %v354_v17, %v241_v27  ;;  %235 = vst [vmem:[%s524_s2 + $0x60] sm:$0xff] %v208_v30  ;;  %v268_v37 = vmul.f32 %v176_v29, %v176_v29 }
  0xda   :  { %v358_v34 = vpop.f32.mrf.mxu0  ;;  %v366_v35 = vpop.f32.mrf.mxu1  ;;  %v276_v63 = vmul.f32 %v208_v30, %v208_v30 }
  0xdb   :  { %v243_v36 = vadd.f32 %v242_v33, %v176_v29  ;;  %v282_v38 = vadd.f32 %v281_v32, %v267_v31  ;;  %230 = vst [vmem:[%s524_s2 + $0x38] sm:$0xff] %v358_v34  ;;  %238 = vst [vmem:[%s524_s2 + $0x78] sm:$0xff] %v366_v35  ;;  %v271_v47 = vmul.f32 %v358_v34, %v358_v34 }
  0xdc   :  { %v179_v39 = vpop.f32.mrf.mxu0  ;;  %v211_v40 = vpop.f32.mrf.mxu1  ;;  %v279_v7 = vmul.f32 %v366_v35, %v366_v35 }
  0xdd   :  { %v283_v41 = vadd.f32 %v282_v38, %v268_v37  ;;  %228 = vst [vmem:[%s524_s2 + $0x28] sm:$0xff] %v179_v39  ;;  %v244_v42 = vadd.f32 %v243_v36, %v179_v39  ;;  %v269_v43 = vmul.f32 %v179_v39, %v179_v39  ;;  %236 = vst [vmem:[%s524_s2 + $0x68] sm:$0xff] %v211_v40 }
  0xde   :  { %v277_v3 = vmul.f32 %v211_v40, %v211_v40 }
  0xdf   :  { %v245_v45 = vadd.f32 %v357_v24, %v244_v42  ;;  %v284_v46 = vadd.f32 %v283_v41, %v269_v43 }
  0xe1   :  { %v246_v48 = vadd.f32 %v358_v34, %v245_v45  ;;  %v285_v49 = vadd.f32 %v284_v46, %v270_v44 }
  0xe3   :  { %v286_v51 = vadd.f32 %v285_v49, %v271_v47  ;;  %v247_v52 = vadd.f32 %v246_v48, %v192_v16 }
  0xe5   :  { %v248_v53 = vadd.f32 %v247_v52, %v195_v20  ;;  %v287_v55 = vadd.f32 %v286_v51, %v272_v50  ;;  %v239_v20 = vld [vmem:[%s522_s3] sm:$0x1] }
  0xe7   :  { %v249_v57 = vadd.f32 %v361_v14, %v248_v53  ;;  %v288_v58 = vadd.f32 %v287_v55, %v273_v54 }
  0xe9   :  { %v289_v60 = vadd.f32 %v288_v58, %v274_v56  ;;  %v250_v61 = vadd.f32 %v362_v18, %v249_v57 }
  0xeb   :  { %v251_v62 = vadd.f32 %v250_v61, %v208_v30  ;;  %v290_v0 = vadd.f32 %v289_v60, %v275_v59 }
  0xed   :  { %v291_v1 = vadd.f32 %v290_v0, %v276_v63  ;;  %v252_v2 = vadd.f32 %v251_v62, %v211_v40 }
  0xef   :  { %v253_v5 = vadd.f32 %v365_v25, %v252_v2  ;;  %v292_v6 = vadd.f32 %v291_v1, %v277_v3 }
  0xf1   :  { %v254_v8 = vadd.f32 %v366_v35, %v253_v5  ;;  %v293_v9 = vadd.f32 %v292_v6, %v278_v4 }
  0xf3   :  { %v255_v10 = vrot.slane %v254_v8, 4  ;;  %v294_v11 = vadd.f32 %v293_v9, %v279_v7 }
  0xf5   :  { %v256_v12 = vadd.f32 %v255_v10, %v254_v8  ;;  %v295_v13 = vrot.slane %v294_v11, 4 }
  0xf7   :  { %v257_v14 = vrot.slane %v256_v12, 2  ;;  %v296_v15 = vadd.f32 %v295_v13, %v294_v11 }
  0xf9   :  { %v258_v16 = vadd.f32 %v257_v14, %v256_v12  ;;  %v297_v17 = vrot.slane %v296_v15, 2 }
  0xfb   :  { %v259_v18 = vrot.slane %v258_v16, 1  ;;  %v298_v19 = vadd.f32 %v297_v17, %v296_v15 }
  0xfd   :  { %v260_v21 = vadd.f32 %v259_v18, %v258_v16  ;;  %v299_v22 = vrot.slane %v298_v19, 1 }
  0xff   :  { %v261_v24 = vadd.f32 %v260_v21, %v239_v20  ;;  %v300_v25 = vadd.f32 %v299_v22, %v298_v19 }
 0x101   :  { %262 = vst [vmem:[%s522_s3] sm:$0x1] %v261_v24  ;;  %v301_v26 = vadd.f32 %v300_v25, %v263_v23 }
 0x103   :  { %302 = vst [vmem:[%s523_s4] sm:$0x1] %v301_v26 }

// kernel: resblock_down_forward.7
= control target key start
LH: loop header
LB: loop body
LE: loop exit
PB: predicated region body
PF: predicated region fallthrough
CT: control target
= control target key end

     0   :  { %s546_s0 = inlined_call_operand.vmem [shape: f32[128,128], index: 0, kind: input, shape index: {}]   ;;  %s547_s1 = inlined_call_operand.vmem [shape: f32[128,128], index: 1, kind: input, shape index: {}]   ;;  %s548_s2 = inlined_call_operand.vmem [shape: f32[1,128], index: 2, kind: input, shape index: {}]   ;;  %s549_s3 = inlined_call_operand.vmem [shape: f32[1,128], index: 3, kind: input, shape index: {}]   ;;  %s550_s4 = inlined_call_operand.vmem [shape: f32[1,128], index: 4, kind: input, shape index: {}]   ;;  %s551_s5 = inlined_call_operand.vmem [shape: f32[1,128], index: 5, kind: input, shape index: {}]   ;;  %s552_s6 = inlined_call_operand.vmem [shape: f32[128,128], index: 6, kind: output, shape index: {}]  }
   0x1   :  { %v23_v0 = vld [vmem:[%s546_s0] sm:$0xff]  ;;  %v24_v8 = vld [vmem:[%s546_s0 + $0x8] sm:$0xff]  ;;  %v25_v10 = vld [vmem:[%s546_s0 + $0x10] sm:$0xff] }
   0x2   :  { %v324_v1 = vld [vmem:[%s548_s2] ss:$0 sm:$0xff]  ;;  %v86_v9 = vld [vmem:[%s547_s1 + $0x8] sm:$0xff]  ;;  %v87_v15 = vld [vmem:[%s547_s1 + $0x10] sm:$0xff] }
   0x3   :  { %v329_v2 = vld [vmem:[%s549_s3] ss:$0 sm:$0xff]  ;;  %v46_v3 = vmul.f32 %v324_v1, %v23_v0  ;;  %v47_v12 = vmul.f32 %v324_v1, %v24_v8  ;;  %v48_v14 = vmul.f32 %v324_v1, %v25_v10  ;;  %v26_v16 = vld [vmem:[%s546_s0 + $0x18] sm:$0xff]  ;;  %v28_v42 = vld [vmem:[%s546_s0 + $0x28] sm:$0xff] }
   0x4   :  { %v85_v4 = vld [vmem:[%s547_s1] sm:$0xff]  ;;  %v88_v17 = vld [vmem:[%s547_s1 + $0x18] sm:$0xff]  ;;  %v49_v20 = vmul.f32 %v324_v1, %v26_v16  ;;  %v90_v47 = vld [vmem:[%s547_s1 + $0x28] sm:$0xff]  ;;  %v51_v55 = vmul.f32 %v324_v1, %v28_v42 }
   0x5   :  { %v338_v5 = vld [vmem:[%s550_s4] ss:$0 sm:$0xff]  ;;  %v69_v11 = vadd.f32 %v329_v2, %v46_v3  ;;  %v70_v23 = vadd.f32 %v329_v2, %v47_v12  ;;  %v71_v26 = vadd.f32 %v329_v2, %v48_v14  ;;  %v29_v48 = vld [vmem:[%s546_s0 + $0x30] sm:$0xff]  ;;  %v30_v60 = vld [vmem:[%s546_s0 + $0x38] sm:$0xff] }
   0x6   :  { %v343_v6 = vld [vmem:[%s551_s5] ss:$0 sm:$0xff]  ;;  %v108_v7 = vmul.f32 %v338_v5, %v85_v4  ;;  %v109_v13 = vmul.f32 %v338_v5, %v86_v9  ;;  %v110_v19 = vmul.f32 %v338_v5, %v87_v15  ;;  %v111_v21 = vmul.f32 %v338_v5, %v88_v17  ;;  %v91_v49 = vld [vmem:[%s547_s1 + $0x30] sm:$0xff] }
   0x7   :  { %vm147_vm0 = vcmp.gt.f32.partialorder %v69_v11, 0.0  ;;  %v163_v22 = vmul.f32 0.2, %v69_v11  ;;  %vm148_vm2 = vcmp.gt.f32.partialorder %v70_v23, 0.0  ;;  %v164_v29 = vmul.f32 0.2, %v70_v23 }
   0x8   :  { %v131_v18 = vadd.f32 %v343_v6, %v108_v7  ;;  %v132_v24 = vadd.f32 %v343_v6, %v109_v13  ;;  %v133_v27 = vadd.f32 %v343_v6, %v110_v19  ;;  %v27_v30 = vld [vmem:[%s546_s0 + $0x20] sm:$0xff]  ;;  %vm149_vm4 = vcmp.gt.f32.partialorder %v71_v26, 0.0  ;;  %v92_v13 = vld [vmem:[%s547_s1 + $0x38] sm:$0xff] }
   0x9   :  { %v179_v28 = vsel %vm147_vm0, %v69_v11, %v163_v22  ;;  %v165_v33 = vmul.f32 0.2, %v71_v26  ;;  %v89_v34 = vld [vmem:[%s547_s1 + $0x20] sm:$0xff]  ;;  %v180_v36 = vsel %vm148_vm2, %v70_v23, %v164_v29  ;;  %v72_v40 = vadd.f32 %v329_v2, %v49_v20 }
   0xa   :  { %vm195_vm1 = vcmp.gt.f32.partialorder %v131_v18, 0.0  ;;  %v211_v25 = vmul.f32 0.2, %v131_v18  ;;  %vm196_vm3 = vcmp.gt.f32.partialorder %v132_v24, 0.0  ;;  %v212_v32 = vmul.f32 0.2, %v132_v24 }
   0xb   :  { %vm197_vm5 = vcmp.gt.f32.partialorder %v133_v27, 0.0  ;;  %v213_v37 = vmul.f32 0.2, %v133_v27  ;;  %v181_v39 = vsel %vm149_vm4, %v71_v26, %v165_v33  ;;  %v134_v41 = vadd.f32 %v343_v6, %v111_v21  ;;  %v31_v14 = vld [vmem:[%s546_s0 + $0x40] sm:$0xff]  ;;  %v32_v26 = vld [vmem:[%s546_s0 + $0x48] sm:$0xff] }
   0xc   :  { %v227_v31 = vsel %vm195_vm1, %v131_v18, %v211_v25  ;;  %v228_v38 = vsel %vm196_vm3, %v132_v24, %v212_v32  ;;  %v50_v45 = vmul.f32 %v324_v1, %v27_v30  ;;  %v112_v46 = vmul.f32 %v338_v5, %v89_v34  ;;  %v93_v21 = vld [vmem:[%s547_s1 + $0x40] sm:$0xff] }
   0xd   :  { %v243_v35 = vadd.f32 %v227_v31, %v179_v28  ;;  %v244_v43 = vadd.f32 %v228_v38, %v180_v36  ;;  %v229_v44 = vsel %vm197_vm5, %v133_v27, %v213_v37  ;;  %vm150_vm6 = vcmp.gt.f32.partialorder %v72_v40, 0.0  ;;  %v94_v27 = vld [vmem:[%s547_s1 + $0x48] sm:$0xff]  ;;  %v33_v28 = vld [vmem:[%s546_s0 + $0x50] sm:$0xff] }
   0xe   :  { %v245_v50 = vadd.f32 %v229_v44, %v181_v39  ;;  %v166_v51 = vmul.f32 0.2, %v72_v40  ;;  %vm198_vm7 = vcmp.gt.f32.partialorder %v134_v41, 0.0  ;;  %v214_v52 = vmul.f32 0.2, %v134_v41 }
   0xf   :  { %259 = vst [vmem:[%s552_s6] sm:$0xff] %v243_v35  ;;  %260 = vst [vmem:[%s552_s6 + $0x8] sm:$0xff] %v244_v43  ;;  %v73_v53 = vadd.f32 %v329_v2, %v50_v45  ;;  %v135_v54 = vadd.f32 %v343_v6, %v112_v46  ;;  %v113_v57 = vmul.f32 %v338_v5, %v90_v47 }
  0x10   :  { %261 = vst [vmem:[%s552_s6 + $0x10] sm:$0xff] %v245_v50  ;;  %v182_v56 = vsel %vm150_vm6, %v72_v40, %v166_v51  ;;  %v52_v58 = vmul.f32 %v324_v1, %v29_v48  ;;  %v114_v59 = vmul.f32 %v338_v5, %v91_v49  ;;  %v230_v61 = vsel %vm198_vm7, %v134_v41, %v214_v52  ;;  %v95_v40 = vld [vmem:[%s547_s1 + $0x50] sm:$0xff] }
  0x11   :  { %vm151_vm8 = vcmp.gt.f32.partialorder %v73_v53, 0.0  ;;  %v167_v62 = vmul.f32 0.2, %v73_v53  ;;  %vm199_vm9 = vcmp.gt.f32.partialorder %v135_v54, 0.0  ;;  %v246_v63 = vadd.f32 %v230_v61, %v182_v56 }
  0x12   :  { %v215_v0 = vmul.f32 0.2, %v135_v54  ;;  %v74_v3 = vadd.f32 %v329_v2, %v51_v55  ;;  %v136_v4 = vadd.f32 %v343_v6, %v113_v57  ;;  %v75_v8 = vadd.f32 %v329_v2, %v52_v58  ;;  %v96_v57 = vld [vmem:[%s547_s1 + $0x58] sm:$0xff]  ;;  %v35_v58 = vld [vmem:[%s546_s0 + $0x60] sm:$0xff] }
  0x13   :  { %v183_v7 = vsel %vm151_vm8, %v73_v53, %v167_v62  ;;  %v137_v9 = vadd.f32 %v343_v6, %v114_v59  ;;  %v53_v10 = vmul.f32 %v324_v1, %v30_v60  ;;  %262 = vst [vmem:[%s552_s6 + $0x18] sm:$0xff] %v246_v63  ;;  %v115_v24 = vmul.f32 %v338_v5, %v92_v13  ;;  %v34_v53 = vld [vmem:[%s546_s0 + $0x58] sm:$0xff]  ;;  %v97_v62 = vld [vmem:[%s547_s1 + $0x60] sm:$0xff]  ;;  %v36_v63 = vld [vmem:[%s546_s0 + $0x68] sm:$0xff] }
  0x14   :  { %v231_v11 = vsel %vm199_vm9, %v135_v54, %v215_v0  ;;  %vm152_vm10 = vcmp.gt.f32.partialorder %v74_v3, 0.0  ;;  %v168_v12 = vmul.f32 0.2, %v74_v3  ;;  %vm200_vm11 = vcmp.gt.f32.partialorder %v136_v4, 0.0 }
  0x15   :  { %v247_v15 = vadd.f32 %v231_v11, %v183_v7  ;;  %v216_v16 = vmul.f32 0.2, %v136_v4  ;;  %vm153_vm12 = vcmp.gt.f32.partialorder %v75_v8, 0.0  ;;  %v169_v17 = vmul.f32 0.2, %v75_v8  ;;  %v98_v7 = vld [vmem:[%s547_s1 + $0x68] sm:$0xff] }
  0x16   :  { %v184_v18 = vsel %vm152_vm10, %v74_v3, %v168_v12  ;;  %vm201_vm13 = vcmp.gt.f32.partialorder %v137_v9, 0.0  ;;  %v217_v19 = vmul.f32 0.2, %v137_v9  ;;  %v76_v20 = vadd.f32 %v329_v2, %v53_v10 }
  0x17   :  { %263 = vst [vmem:[%s552_s6 + $0x20] sm:$0xff] %v247_v15  ;;  %v232_v22 = vsel %vm200_vm11, %v136_v4, %v216_v16  ;;  %v185_v23 = vsel %vm153_vm12, %v75_v8, %v169_v17  ;;  %v54_v25 = vmul.f32 %v324_v1, %v31_v14  ;;  %v138_v33 = vadd.f32 %v343_v6, %v115_v24 }
  0x18   :  { %v248_v29 = vadd.f32 %v232_v22, %v184_v18  ;;  %v233_v30 = vsel %vm201_vm13, %v137_v9, %v217_v19  ;;  %vm154_vm14 = vcmp.gt.f32.partialorder %v76_v20, 0.0  ;;  %v170_v31 = vmul.f32 0.2, %v76_v20 }
  0x19   :  { %v249_v32 = vadd.f32 %v233_v30, %v185_v23  ;;  %v77_v34 = vadd.f32 %v329_v2, %v54_v25  ;;  %v116_v35 = vmul.f32 %v338_v5, %v93_v21  ;;  %v55_v37 = vmul.f32 %v324_v1, %v32_v26 }
  0x1a   :  { %264 = vst [vmem:[%s552_s6 + $0x28] sm:$0xff] %v248_v29  ;;  %v186_v36 = vsel %vm154_vm14, %v76_v20, %v170_v31  ;;  %v117_v38 = vmul.f32 %v338_v5, %v94_v27  ;;  %v56_v39 = vmul.f32 %v324_v1, %v33_v28  ;;  %vm202_vm15 = vcmp.gt.f32.partialorder %v138_v33, 0.0  ;;  %v37_v28 = vld [vmem:[%s546_s0 + $0x70] sm:$0xff] }
  0x1b   :  { %265 = vst [vmem:[%s552_s6 + $0x30] sm:$0xff] %v249_v32  ;;  %v218_v41 = vmul.f32 0.2, %v138_v33  ;;  %v139_v42 = vadd.f32 %v343_v6, %v116_v35  ;;  %vm155_vm0 = vcmp.gt.f32.partialorder %v77_v34, 0.0  ;;  %v171_v43 = vmul.f32 0.2, %v77_v34 }
  0x1c   :  { %v78_v44 = vadd.f32 %v329_v2, %v55_v37  ;;  %v140_v45 = vadd.f32 %v343_v6, %v117_v38  ;;  %v79_v46 = vadd.f32 %v329_v2, %v56_v39  ;;  %v118_v49 = vmul.f32 %v338_v5, %v95_v40  ;;  %v99_v29 = vld [vmem:[%s547_s1 + $0x70] sm:$0xff] }
  0x1d   :  { %v234_v47 = vsel %vm202_vm15, %v138_v33, %v218_v41  ;;  %vm203_vm1 = vcmp.gt.f32.partialorder %v139_v42, 0.0  ;;  %v219_v48 = vmul.f32 0.2, %v139_v42  ;;  %v187_v51 = vsel %vm155_vm0, %v77_v34, %v171_v43  ;;  %v38_v33 = vld [vmem:[%s546_s0 + $0x78] sm:$0xff] }
  0x1e   :  { %v250_v50 = vadd.f32 %v234_v47, %v186_v36  ;;  %vm156_vm2 = vcmp.gt.f32.partialorder %v78_v44, 0.0  ;;  %v172_v52 = vmul.f32 0.2, %v78_v44  ;;  %vm204_vm3 = vcmp.gt.f32.partialorder %v140_v45, 0.0  ;;  %v100_v34 = vld [vmem:[%s547_s1 + $0x78] sm:$0xff] }
  0x1f   :  { %v235_v54 = vsel %vm203_vm1, %v139_v42, %v219_v48  ;;  %v220_v55 = vmul.f32 0.2, %v140_v45  ;;  %v141_v56 = vadd.f32 %v343_v6, %v118_v49  ;;  %vm157_vm4 = vcmp.gt.f32.partialorder %v79_v46, 0.0 }
  0x20   :  { %266 = vst [vmem:[%s552_s6 + $0x38] sm:$0xff] %v250_v50  ;;  %v251_v59 = vadd.f32 %v235_v54, %v187_v51  ;;  %v188_v60 = vsel %vm156_vm2, %v78_v44, %v172_v52  ;;  %v173_v61 = vmul.f32 0.2, %v79_v46  ;;  %v57_v4 = vmul.f32 %v324_v1, %v34_v53 }
  0x21   :  { %v236_v0 = vsel %vm204_vm3, %v140_v45, %v220_v55  ;;  %vm205_vm5 = vcmp.gt.f32.partialorder %v141_v56, 0.0  ;;  %v221_v3 = vmul.f32 0.2, %v141_v56  ;;  %v119_v10 = vmul.f32 %v338_v5, %v96_v57 }
  0x22   :  { %267 = vst [vmem:[%s552_s6 + $0x40] sm:$0xff] %v251_v59  ;;  %v252_v8 = vadd.f32 %v236_v0, %v188_v60  ;;  %v189_v9 = vsel %vm157_vm4, %v79_v46, %v173_v61  ;;  %v58_v11 = vmul.f32 %v324_v1, %v35_v58  ;;  %v80_v13 = vadd.f32 %v329_v2, %v57_v4 }
  0x23   :  { %v237_v12 = vsel %vm205_vm5, %v141_v56, %v221_v3  ;;  %v120_v14 = vmul.f32 %v338_v5, %v97_v62  ;;  %v59_v15 = vmul.f32 %v324_v1, %v36_v63  ;;  %v142_v17 = vadd.f32 %v343_v6, %v119_v10 }
  0x24   :  { %268 = vst [vmem:[%s552_s6 + $0x48] sm:$0xff] %v252_v8  ;;  %v253_v16 = vadd.f32 %v237_v12, %v189_v9  ;;  %v81_v18 = vadd.f32 %v329_v2, %v58_v11  ;;  %v121_v19 = vmul.f32 %v338_v5, %v98_v7  ;;  %vm158_vm6 = vcmp.gt.f32.partialorder %v80_v13, 0.0 }
  0x25   :  { %v174_v20 = vmul.f32 0.2, %v80_v13  ;;  %v143_v21 = vadd.f32 %v343_v6, %v120_v14  ;;  %v82_v22 = vadd.f32 %v329_v2, %v59_v15  ;;  %vm206_vm7 = vcmp.gt.f32.partialorder %v142_v17, 0.0 }
  0x26   :  { %269 = vst [vmem:[%s552_s6 + $0x50] sm:$0xff] %v253_v16  ;;  %v222_v23 = vmul.f32 0.2, %v142_v17  ;;  %vm159_vm8 = vcmp.gt.f32.partialorder %v81_v18, 0.0  ;;  %v175_v24 = vmul.f32 0.2, %v81_v18  ;;  %v144_v27 = vadd.f32 %v343_v6, %v121_v19 }
  0x27   :  { %v190_v25 = vsel %vm158_vm6, %v80_v13, %v174_v20  ;;  %vm207_vm9 = vcmp.gt.f32.partialorder %v143_v21, 0.0  ;;  %v223_v26 = vmul.f32 0.2, %v143_v21  ;;  %vm160_vm10 = vcmp.gt.f32.partialorder %v82_v22, 0.0 }
  0x28   :  { %v238_v30 = vsel %vm206_vm7, %v142_v17, %v222_v23  ;;  %v191_v31 = vsel %vm159_vm8, %v81_v18, %v175_v24  ;;  %v176_v32 = vmul.f32 0.2, %v82_v22  ;;  %vm208_vm11 = vcmp.gt.f32.partialorder %v144_v27, 0.0 }
  0x29   :  { %v254_v35 = vadd.f32 %v238_v30, %v190_v25  ;;  %v239_v36 = vsel %vm207_vm9, %v143_v21, %v223_v26  ;;  %v224_v37 = vmul.f32 0.2, %v144_v27  ;;  %v60_v40 = vmul.f32 %v324_v1, %v37_v28 }
  0x2a   :  { %v255_v38 = vadd.f32 %v239_v36, %v191_v31  ;;  %v192_v39 = vsel %vm160_vm10, %v82_v22, %v176_v32  ;;  %v122_v41 = vmul.f32 %v338_v5, %v99_v29  ;;  %v61_v43 = vmul.f32 %v324_v1, %v38_v33 }
  0x2b   :  { %270 = vst [vmem:[%s552_s6 + $0x58] sm:$0xff] %v254_v35  ;;  %v240_v42 = vsel %vm208_vm11, %v144_v27, %v224_v37  ;;  %v123_v44 = vmul.f32 %v338_v5, %v100_v34  ;;  %v83_v46 = vadd.f32 %v329_v2, %v60_v40 }
  0x2c   :  { %271 = vst [vmem:[%s552_s6 + $0x60] sm:$0xff] %v255_v38  ;;  %v256_v45 = vadd.f32 %v240_v42, %v192_v39  ;;  %v145_v47 = vadd.f32 %v343_v6, %v122_v41  ;;  %v84_v48 = vadd.f32 %v329_v2, %v61_v43 }
  0x2d   :  { %v146_v49 = vadd.f32 %v343_v6, %v123_v44  ;;  %vm161_vm12 = vcmp.gt.f32.partialorder %v83_v46, 0.0  ;;  %v177_v1 = vmul.f32 0.2, %v83_v46 }
  0x2e   :  { %272 = vst [vmem:[%s552_s6 + $0x68] sm:$0xff] %v256_v45  ;;  %vm209_vm13 = vcmp.gt.f32.partialorder %v145_v47, 0.0  ;;  %v225_v5 = vmul.f32 0.2, %v145_v47  ;;  %vm162_vm14 = vcmp.gt.f32.partialorder %v84_v48, 0.0 }
  0x2f   :  { %v178_v50 = vmul.f32 0.2, %v84_v48  ;;  %vm210_vm15 = vcmp.gt.f32.partialorder %v146_v49, 0.0  ;;  %v226_v51 = vmul.f32 0.2, %v146_v49  ;;  %v193_v52 = vsel %vm161_vm12, %v83_v46, %v177_v1 }
  0x30   :  { %v241_v53 = vsel %vm209_vm13, %v145_v47, %v225_v5 }
  0x31   :  { %v257_v54 = vadd.f32 %v241_v53, %v193_v52  ;;  %v194_v55 = vsel %vm162_vm14, %v84_v48, %v178_v50  ;;  %v242_v56 = vsel %vm210_vm15, %v146_v49, %v226_v51 }
  0x32   :  { %v258_v2 = vadd.f32 %v242_v56, %v194_v55 }
  0x33   :  { %273 = vst [vmem:[%s552_s6 + $0x70] sm:$0xff] %v257_v54 }
  0x34   :  { %274 = vst [vmem:[%s552_s6 + $0x78] sm:$0xff] %v258_v2 }

</bundles_post_ra>
